<compile_context>
chip_gen: v5e
topology: v5e:2x2
jax: 0.10.0
libtpu: 0.0.40
codegen_flags: <defaults>
</compile_context>

<pallas_src>
import jax
import jax.numpy as jnp
from jax import lax
from jax.experimental import pallas as pl
from jax.experimental.pallas import tpu as pltpu

Q_DIM = 128  # hidden width of BClassifier.q (hard-coded to 128 in dsmil.py)


def milnet_kernel(x_ref, wi_ref, wfused_ref, bfused_ref, q2w_ref, q2b_ref,
                  fccw_ref, fccb_ref,
                  classes_ref, bag_ref, At_ref, Bflat_ref):
    """Weights arrive pre-packed: K-major, class dim padded to Cpad lanes, bf16."""
    N, K = x_ref.shape
    C = wi_ref.shape[0]
    Cpad = classes_ref.shape[1]
    qd = q2w_ref.shape[0]

    x = x_ref[...]                                                      # [N, K] bf16

    # ---- fused i_classifier + q layer 1: one pass of x through the MXU ----
    xh = jnp.dot(x, wfused_ref[...],
                 preferred_element_type=jnp.float32) + bfused_ref[...]  # [N, Cpad+qd] f32
    classes_ref[...] = xh[:, :Cpad]                                     # lane-dense store
    h = jnp.maximum(xh[:, Cpad:], 0.0)                                  # [N, qd]

    # ---- q layer 2 (single bf16 copy of Qm reused by gather + logits) ----
    Qm = jnp.tanh(jnp.dot(h.astype(jnp.bfloat16), q2w_ref[...],
                          preferred_element_type=jnp.float32) + q2b_ref[...])   # [N, qd] f32
    Qm_bf = Qm.astype(jnp.bfloat16)

    # ---- critical-instance selection, built natively class-major [C, N] ----
    # Bias-free class scores (the per-class bias cannot change argmax over instances);
    # tiny NT matmul keeps the per-class max / first-argmax as pure lane reductions.
    cls_cm = lax.dot_general(wi_ref[...], x, (((1,), (1,)), ((), ())),
                             preferred_element_type=jnp.float32)        # [C, N]
    maxv = jnp.max(cls_cm, axis=1, keepdims=True)                       # [C, 1]
    iota_cn = lax.broadcasted_iota(jnp.int32, cls_cm.shape, 1)          # [C, N]
    idx = jnp.min(jnp.where(cls_cm == maxv, iota_cn, N),
                  axis=1, keepdims=True)                                # [C, 1] first-max idx
    onehot_cn = (iota_cn == idx).astype(jnp.bfloat16)                   # [C, N]

    # q(m_feats) == rows of q(feats): exact 0/1 gather of the critical Qm rows (bf16 pass).
    q_max = jnp.dot(onehot_cn, Qm_bf, preferred_element_type=jnp.float32)     # [C, qd] f32
    q_max_bf = (q_max * (1.0 / (qd ** 0.5))).astype(jnp.bfloat16)       # scale folded here

    # ---- attention, class-major: softmax over instances is a lane reduction ----
    logits_t = lax.dot_general(q_max_bf, Qm_bf, (((1,), (1,)), ((), ())),
                               preferred_element_type=jnp.float32)      # [C, N]
    logits_t = logits_t - jnp.max(logits_t, axis=-1, keepdims=True)
    e = jnp.exp(logits_t)
    A_t = e * pl.reciprocal(jnp.sum(e, axis=-1, keepdims=True), approx=True)   # [C, N]
    At_ref[...] = A_t

    # ---- bag representation: B = A^T @ V (V = feats), NN matmul ----
    Bmat = jnp.dot(A_t.astype(jnp.bfloat16), x,
                   preferred_element_type=jnp.float32)                  # [C, K] f32
    # Lay B out row-flat so fcc is a SINGLE [1, C*K] x [C*K, Cpad] MXU matmul.
    for i in range(C):                                                  # C small & static
        Bflat_ref[:, i * K:(i + 1) * K] = Bmat[i:i + 1, :]

    # ---- fcc: Conv1d(C, C, kernel_size=K) == full [C, K] contraction per output class ----
    bag_ref[...] = jnp.dot(Bflat_ref[...].astype(jnp.bfloat16), fccw_ref[...],
                           preferred_element_type=jnp.float32) + fccb_ref[...]  # [1, Cpad]


def pack_milnet_params(params):
    """One-time weight prep: pre-transpose (K-major), pad class dim to 128 lanes, cast bf16."""
    C, K = params["wi"].shape
    Cpad = ((C + 127) // 128) * 128

    wi_pad = jnp.zeros((Cpad, K), jnp.float32).at[:C].set(params["wi"])
    wfused_t = jnp.concatenate([wi_pad, params["q1w"]], axis=0).T.astype(jnp.bfloat16)  # [K, Cpad+qd]
    bi_pad = jnp.zeros((1, Cpad), jnp.float32).at[:, :C].set(params["bi"])
    bfused = jnp.concatenate([bi_pad, params["q1b"]], axis=1).astype(jnp.float32)       # [1, Cpad+qd]
    fccw_flat = jnp.zeros((C * K, Cpad), jnp.float32).at[:, :C].set(
        jnp.transpose(params["fccw"], (1, 2, 0)).reshape(C * K, C)).astype(jnp.bfloat16)
    fccb_pad = jnp.zeros((1, Cpad), jnp.float32).at[:, :C].set(params["fccb"])

    return {
        "wi_cm": params["wi"].astype(jnp.bfloat16),        # [C, K]  (class-major, selection)
        "wfused_t": wfused_t,                              # [K, Cpad+qd]
        "bfused": bfused,                                  # [1, Cpad+qd]
        "q2w_t": params["q2w"].T.astype(jnp.bfloat16),     # [qd, qd]
        "q2b": params["q2b"].astype(jnp.float32),          # [1, qd]
        "fccw_flat": fccw_flat,                            # [C*K, Cpad]
        "fccb_pad": fccb_pad,                              # [1, Cpad]
    }


def _vmem_limit_bytes(N, K, C, Cpad, qd):
    est = (N * K * 2 + C * K * 2 + K * (Cpad + qd) * 2 + (Cpad + qd) * 4        # x + weights
           + qd * qd * 2 + qd * 4 + C * K * Cpad * 2 + 2 * Cpad * 4
           + N * (Cpad + qd) * 4                                                # fused activation
           + N * Cpad * 4 + N * qd * 6                                          # classes, Qm f32+bf16
           + 3 * C * N * 4 + 2 * C * K * 4 + Cpad * 4)                          # cls_cm, A_t, B, bag
    # 2x margin for copies/double buffers; clamp under the v7x 64 MiB VMEM ceiling
    # (v5e/v6e have 128 MiB and could go higher single-shot, but 48 MiB is safe everywhere).
    return int(min(max(2 * est, 8 * 1024 * 1024), 48 * 1024 * 1024))


@jax.jit
def milnet_forward(x, packed):
    N, K = x.shape
    C = packed["wi_cm"].shape[0]
    Cpad = packed["fccb_pad"].shape[1]
    qd = packed["q2w_t"].shape[0]

    # Advisory cost estimate so XLA does not treat the custom call as zero-cost.
    flops = (2 * N * K * (Cpad + qd) + 2 * N * qd * qd            # fused pass, q2
             + 2 * C * N * K + 2 * C * N * qd                     # class-major scores, gather
             + 2 * C * N * qd + 2 * C * N * K + 2 * C * K * Cpad)  # logits, B, fcc
    transcendentals = N * qd + C * N                               # tanh + exp
    bytes_accessed = (N * K * 2 + C * K * 2 + K * (Cpad + qd) * 2 + (Cpad + qd) * 4
                      + qd * qd * 2 + qd * 4 + C * K * Cpad * 2 + 2 * Cpad * 4
                      + N * Cpad * 4 + Cpad * 4 + C * N * 4 + C * K * 4)

    vmem = pl.BlockSpec(memory_space=pltpu.MemorySpace.VMEM)
    classes_pad, bag_pad, A_t, B_flat = pl.pallas_call(
        milnet_kernel,
        out_shape=(
            jax.ShapeDtypeStruct((N, Cpad), jnp.float32),   # classes (padded, lane-dense)
            jax.ShapeDtypeStruct((1, Cpad), jnp.float32),   # bag logits (padded, lane-dense)
            jax.ShapeDtypeStruct((C, N), jnp.float32),      # A^T (instances on lanes)
            jax.ShapeDtypeStruct((1, C * K), jnp.float32),  # B, row-flattened
        ),
        in_specs=[vmem] * 8,
        out_specs=(vmem, vmem, vmem, vmem),
        compiler_params=pltpu.CompilerParams(
            vmem_limit_bytes=_vmem_limit_bytes(N, K, C, Cpad, qd)),
        cost_estimate=pl.CostEstimate(flops=flops, transcendentals=transcendentals,
                                      bytes_accessed=bytes_accessed),
    )(x.astype(jnp.bfloat16), packed["wi_cm"], packed["wfused_t"], packed["bfused"],
      packed["q2w_t"], packed["q2b"], packed["fccw_flat"], packed["fccb_pad"])

    classes = classes_pad[:, :C]
    prediction_bag = bag_pad[:, :C]        # 1 x C, as in dsmil
    A = A_t.T                              # back to [N, C] (module's convention)
    B = B_flat.reshape(C, K)
    return classes, prediction_bag, A, B


def ref_forward(x, p, classes_for_select):
    """Plain-JAX f32 reference mirroring the PyTorch forward (sanity check)."""
    classes = x @ p["wi"].T + p["bi"]

    def q(v):
        h = jnp.maximum(v @ p["q1w"].T + p["q1b"], 0.0)
        return jnp.tanh(h @ p["q2w"].T + p["q2b"])

    Q = q(x)
    idx = jnp.argmax(classes_for_select, axis=0)          # critical instance per class
    m_feats = x[idx]
    q_max = q(m_feats)
    A = jax.nn.softmax((Q @ q_max.T) / (Q_DIM ** 0.5), axis=0)
    B = A.T @ x
    bag = jnp.einsum("oik,ik->o", p["fccw"], B)[None, :] + p["fccb"]
    return classes, bag, A, B


if __name__ == "__main__":
    N, K, C = 8, 32, 4    # N instances per bag, K features, C classes

    key = jax.random.PRNGKey(0)
    ks = jax.random.split(key, 10)

    def uinit(k, shape, fan_in):
        b = 1.0 / (fan_in ** 0.5)
        return jax.random.uniform(k, shape, jnp.float32, -b, b)

    params = {
        "wi":   uinit(ks[0], (C, K), K),              # FCLayer / i_classifier Linear
        "bi":   uinit(ks[1], (1, C), K),
        "q1w":  uinit(ks[2], (Q_DIM, K), K),          # q: Linear(K,128)
        "q1b":  uinit(ks[3], (1, Q_DIM), K),
        "q2w":  uinit(ks[4], (Q_DIM, Q_DIM), Q_DIM),  # q: Linear(128,128)
        "q2b":  uinit(ks[5], (1, Q_DIM), Q_DIM),
        "fccw": uinit(ks[6], (C, C, K), C * K),       # Conv1d(C, C, kernel_size=K)
        "fccb": uinit(ks[7], (1, C), C * K),
    }
    x = jax.random.normal(ks[8], (N, K), jnp.float32)

    packed = pack_milnet_params(params)               # one-time weight prep (hoisted)

    outs = milnet_forward(x, packed)
    outs = jax.block_until_ready(outs)
    classes, prediction_bag, A, B = outs

    # shape / sanity checks
    assert classes.shape == (N, C)
    assert prediction_bag.shape == (1, C)
    assert A.shape == (N, C)
    assert B.shape == (C, K)
    for o in outs:
        assert bool(jnp.all(jnp.isfinite(o)))

    # use the kernel's classes for the selection step so tie/rounding order matches
    r_classes, r_bag, r_A, r_B = ref_forward(x, params, classes)
    assert bool(jnp.allclose(classes, r_classes, rtol=2e-2, atol=2e-2))
    assert bool(jnp.allclose(A, r_A, rtol=2e-2, atol=2e-2))
    assert bool(jnp.allclose(B, r_B, rtol=2e-2, atol=2e-2))
    assert bool(jnp.allclose(prediction_bag, r_bag, rtol=2e-2, atol=2e-2))

    print("KERNEL_OK")
</pallas_src>

<mosaic_0001>
module attributes {stable_mosaic.version = 11 : i64} {
  func.func @milnet_kernel(%arg0: memref<8x32xbf16, #tpu.memory_space<vmem>>, %arg1: memref<4x32xbf16, #tpu.memory_space<vmem>>, %arg2: memref<32x256xbf16, #tpu.memory_space<vmem>>, %arg3: memref<1x256xf32, #tpu.memory_space<vmem>>, %arg4: memref<128x128xbf16, #tpu.memory_space<vmem>>, %arg5: memref<1x128xf32, #tpu.memory_space<vmem>>, %arg6: memref<128x128xbf16, #tpu.memory_space<vmem>>, %arg7: memref<1x128xf32, #tpu.memory_space<vmem>>, %arg8: memref<8x128xf32, #tpu.memory_space<vmem>>, %arg9: memref<1x128xf32, #tpu.memory_space<vmem>>, %arg10: memref<4x8xf32, #tpu.memory_space<vmem>>, %arg11: memref<1x128xf32, #tpu.memory_space<vmem>>) attributes {dimension_semantics = [], scalar_prefetch = 0 : i64, scratch_operands = 0 : i64, tpu.core_type = #tpu.core_type<tc>} {
    %c0 = arith.constant 0 : index
    %c0_0 = arith.constant 0 : index
    %0 = vector.load %arg0[%c0, %c0_0] : memref<8x32xbf16, #tpu.memory_space<vmem>>, vector<8x32xbf16>
    %c0_1 = arith.constant 0 : index
    %c0_2 = arith.constant 0 : index
    %1 = vector.load %arg2[%c0_1, %c0_2] : memref<32x256xbf16, #tpu.memory_space<vmem>>, vector<32x256xbf16>
    %cst = arith.constant dense<0.000000e+00> : vector<8x256xf32>
    %2 = tpu.matmul %0, %1, %cst {dimension_numbers = #tpu.dot_dimension_numbers<[1], [0], [0], [1], [0, 0, 1, 1], [], []>} : vector<8x32xbf16>, vector<32x256xbf16>, vector<8x256xf32> -> vector<8x256xf32>
    %c0_3 = arith.constant 0 : index
    %c0_4 = arith.constant 0 : index
    %3 = vector.load %arg3[%c0_3, %c0_4] : memref<1x256xf32, #tpu.memory_space<vmem>>, vector<1x256xf32>
    %4 = vector.broadcast %3 : vector<1x256xf32> to vector<8x256xf32>
    %5 = arith.addf %2, %4 : vector<8x256xf32>
    %6 = vector.extract_strided_slice %5 {offsets = [0, 0], sizes = [8, 128], strides = [1, 1]} : vector<8x256xf32> to vector<8x128xf32>
    %c0_5 = arith.constant 0 : index
    %c0_6 = arith.constant 0 : index
    %7 = vector.load %arg8[%c0_5, %c0_6] : memref<8x128xf32, #tpu.memory_space<vmem>>, vector<8x128xf32>
    tpu.vector_store %arg8[%c0_5, %c0_6], %6 {strides = array<i32>} : memref<8x128xf32, #tpu.memory_space<vmem>>, vector<8x128xf32>,
    %8 = vector.extract_strided_slice %5 {offsets = [0, 128], sizes = [8, 128], strides = [1, 1]} : vector<8x256xf32> to vector<8x128xf32>
    %cst_7 = arith.constant 0.000000e+00 : f32
    %9 = vector.broadcast %cst_7 : f32 to vector<8x128xf32>
    %10 = arith.maximumf %8, %9 : vector<8x128xf32>
    %11 = arith.truncf %10 : vector<8x128xf32> to vector<8x128xbf16>
    %c0_8 = arith.constant 0 : index
    %c0_9 = arith.constant 0 : index
    %12 = vector.load %arg4[%c0_8, %c0_9] : memref<128x128xbf16, #tpu.memory_space<vmem>>, vector<128x128xbf16>
    %cst_10 = arith.constant dense<0.000000e+00> : vector<8x128xf32>
    %13 = tpu.matmul %11, %12, %cst_10 {dimension_numbers = #tpu.dot_dimension_numbers<[1], [0], [0], [1], [0, 0, 1, 1], [], []>} : vector<8x128xbf16>, vector<128x128xbf16>, vector<8x128xf32> -> vector<8x128xf32>
    %c0_11 = arith.constant 0 : index
    %c0_12 = arith.constant 0 : index
    %14 = vector.load %arg5[%c0_11, %c0_12] : memref<1x128xf32, #tpu.memory_space<vmem>>, vector<1x128xf32>
    %15 = vector.broadcast %14 : vector<1x128xf32> to vector<8x128xf32>
    %16 = arith.addf %13, %15 : vector<8x128xf32>
    %17 = math.tanh %16 : vector<8x128xf32>
    %18 = arith.truncf %17 : vector<8x128xf32> to vector<8x128xbf16>
    %c0_13 = arith.constant 0 : index
    %c0_14 = arith.constant 0 : index
    %19 = vector.load %arg1[%c0_13, %c0_14] : memref<4x32xbf16, #tpu.memory_space<vmem>>, vector<4x32xbf16>
    %cst_15 = arith.constant dense<0.000000e+00> : vector<4x8xf32>
    %20 = tpu.matmul %19, %0, %cst_15 {dimension_numbers = #tpu.dot_dimension_numbers<[1], [1], [0], [0], [0, 0, 1, 0], [], []>} : vector<4x32xbf16>, vector<8x32xbf16>, vector<4x8xf32> -> vector<4x8xf32>
    %cst_16 = arith.constant dense<0xFF800000> : vector<4xf32>
    %21 = vector.multi_reduction <maximumf>, %20, %cst_16 [1] : vector<4x8xf32> to vector<4xf32>
    %22 = vector.shape_cast %21 : vector<4xf32> to vector<4x1xf32>
    %23 = tpu.iota {dimensions = array<i32: 1>} : vector<4x8xi32>
    %24 = vector.broadcast %22 : vector<4x1xf32> to vector<4x8xf32>
    %25 = arith.cmpf oeq, %20, %24 : vector<4x8xf32>
    %c8_i32 = arith.constant 8 : i32
    %26 = vector.broadcast %c8_i32 : i32 to vector<4x8xi32>
    %27 = arith.select %25, %23, %26 : vector<4x8xi1>, vector<4x8xi32>
    %cst_17 = arith.constant dense<2147483647> : vector<4xi32>
    %28 = vector.multi_reduction <minsi>, %27, %cst_17 [1] : vector<4x8xi32> to vector<4xi32>
    %29 = vector.shape_cast %28 : vector<4xi32> to vector<4x1xi32>
    %30 = vector.broadcast %29 : vector<4x1xi32> to vector<4x8xi32>
    %31 = arith.cmpi eq, %23, %30 : vector<4x8xi32>
    %32 = arith.extui %31 : vector<4x8xi1> to vector<4x8xi32>
    %33 = arith.sitofp %32 : vector<4x8xi32> to vector<4x8xf32>
    %34 = arith.truncf %33 : vector<4x8xf32> to vector<4x8xbf16>
    %cst_18 = arith.constant dense<0.000000e+00> : vector<4x128xf32>
    %35 = tpu.matmul %34, %18, %cst_18 {dimension_numbers = #tpu.dot_dimension_numbers<[1], [0], [0], [1], [0, 0, 1, 1], [], []>} : vector<4x8xbf16>, vector<8x128xbf16>, vector<4x128xf32> -> vector<4x128xf32>
    %cst_19 = arith.constant 0.0883883461 : f32
    %36 = vector.broadcast %cst_19 : f32 to vector<4x128xf32>
    %37 = arith.mulf %35, %36 : vector<4x128xf32>
    %38 = arith.truncf %37 : vector<4x128xf32> to vector<4x128xbf16>
    %cst_20 = arith.constant dense<0.000000e+00> : vector<4x8xf32>
    %39 = tpu.matmul %38, %18, %cst_20 {dimension_numbers = #tpu.dot_dimension_numbers<[1], [1], [0], [0], [0, 0, 1, 0], [], []>} : vector<4x128xbf16>, vector<8x128xbf16>, vector<4x8xf32> -> vector<4x8xf32>
    %cst_21 = arith.constant dense<0xFF800000> : vector<4xf32>
    %40 = vector.multi_reduction <maximumf>, %39, %cst_21 [1] : vector<4x8xf32> to vector<4xf32>
    %41 = vector.shape_cast %40 : vector<4xf32> to vector<4x1xf32>
    %42 = vector.broadcast %41 : vector<4x1xf32> to vector<4x8xf32>
    %43 = arith.subf %39, %42 : vector<4x8xf32>
    %44 = math.exp %43 : vector<4x8xf32>
    %cst_22 = arith.constant dense<0.000000e+00> : vector<4xf32>
    %45 = vector.multi_reduction <add>, %44, %cst_22 [1] : vector<4x8xf32> to vector<4xf32>
    %46 = vector.shape_cast %45 : vector<4xf32> to vector<4x1xf32>
    %47 = tpu.reciprocal %46 {approx = true} : vector<4x1xf32> -> vector<4x1xf32>
    %48 = vector.broadcast %47 : vector<4x1xf32> to vector<4x8xf32>
    %49 = arith.mulf %44, %48 : vector<4x8xf32>
    %c0_23 = arith.constant 0 : index
    %c0_24 = arith.constant 0 : index
    %50 = vector.load %arg10[%c0_23, %c0_24] : memref<4x8xf32, #tpu.memory_space<vmem>>, vector<4x8xf32>
    tpu.vector_store %arg10[%c0_23, %c0_24], %49 {strides = array<i32>} : memref<4x8xf32, #tpu.memory_space<vmem>>, vector<4x8xf32>,
    %51 = arith.truncf %49 : vector<4x8xf32> to vector<4x8xbf16>
    %cst_25 = arith.constant dense<0.000000e+00> : vector<4x32xf32>
    %52 = tpu.matmul %51, %0, %cst_25 {dimension_numbers = #tpu.dot_dimension_numbers<[1], [0], [0], [1], [0, 0, 1, 1], [], []>} : vector<4x8xbf16>, vector<8x32xbf16>, vector<4x32xf32> -> vector<4x32xf32>
    %53 = vector.extract_strided_slice %52 {offsets = [0, 0], sizes = [1, 32], strides = [1, 1]} : vector<4x32xf32> to vector<1x32xf32>
    %c0_26 = arith.constant 0 : index
    %c0_27 = arith.constant 0 : index
    %54 = vector.load %arg11[%c0_26, %c0_27] : memref<1x128xf32, #tpu.memory_space<vmem>>, vector<1x32xf32>
    tpu.vector_store %arg11[%c0_26, %c0_27], %53 {strides = array<i32>} : memref<1x128xf32, #tpu.memory_space<vmem>>, vector<1x32xf32>,
    %55 = vector.extract_strided_slice %52 {offsets = [1, 0], sizes = [1, 32], strides = [1, 1]} : vector<4x32xf32> to vector<1x32xf32>
    %c0_28 = arith.constant 0 : index
    %c32 = arith.constant 32 : index
    %56 = vector.load %arg11[%c0_28, %c32] : memref<1x128xf32, #tpu.memory_space<vmem>>, vector<1x32xf32>
    tpu.vector_store %arg11[%c0_28, %c32], %55 {strides = array<i32>} : memref<1x128xf32, #tpu.memory_space<vmem>>, vector<1x32xf32>,
    %57 = vector.extract_strided_slice %52 {offsets = [2, 0], sizes = [1, 32], strides = [1, 1]} : vector<4x32xf32> to vector<1x32xf32>
    %c0_29 = arith.constant 0 : index
    %c64 = arith.constant 64 : index
    %58 = vector.load %arg11[%c0_29, %c64] : memref<1x128xf32, #tpu.memory_space<vmem>>, vector<1x32xf32>
    tpu.vector_store %arg11[%c0_29, %c64], %57 {strides = array<i32>} : memref<1x128xf32, #tpu.memory_space<vmem>>, vector<1x32xf32>,
    %59 = vector.extract_strided_slice %52 {offsets = [3, 0], sizes = [1, 32], strides = [1, 1]} : vector<4x32xf32> to vector<1x32xf32>
    %c0_30 = arith.constant 0 : index
    %c96 = arith.constant 96 : index
    %60 = vector.load %arg11[%c0_30, %c96] : memref<1x128xf32, #tpu.memory_space<vmem>>, vector<1x32xf32>
    tpu.vector_store %arg11[%c0_30, %c96], %59 {strides = array<i32>} : memref<1x128xf32, #tpu.memory_space<vmem>>, vector<1x32xf32>,
    %c0_31 = arith.constant 0 : index
    %c0_32 = arith.constant 0 : index
    %61 = vector.load %arg11[%c0_31, %c0_32] : memref<1x128xf32, #tpu.memory_space<vmem>>, vector<1x128xf32>
    %62 = arith.truncf %61 : vector<1x128xf32> to vector<1x128xbf16>
    %c0_33 = arith.constant 0 : index
    %c0_34 = arith.constant 0 : index
    %63 = vector.load %arg6[%c0_33, %c0_34] : memref<128x128xbf16, #tpu.memory_space<vmem>>, vector<128x128xbf16>
    %cst_35 = arith.constant dense<0.000000e+00> : vector<1x128xf32>
    %64 = tpu.matmul %62, %63, %cst_35 {dimension_numbers = #tpu.dot_dimension_numbers<[1], [0], [0], [1], [0, 0, 1, 1], [], []>} : vector<1x128xbf16>, vector<128x128xbf16>, vector<1x128xf32> -> vector<1x128xf32>
    %c0_36 = arith.constant 0 : index
    %c0_37 = arith.constant 0 : index
    %65 = vector.load %arg7[%c0_36, %c0_37] : memref<1x128xf32, #tpu.memory_space<vmem>>, vector<1x128xf32>
    %66 = arith.addf %64, %65 : vector<1x128xf32>
    %c0_38 = arith.constant 0 : index
    %c0_39 = arith.constant 0 : index
    %67 = vector.load %arg9[%c0_38, %c0_39] : memref<1x128xf32, #tpu.memory_space<vmem>>, vector<1x128xf32>
    tpu.vector_store %arg9[%c0_38, %c0_39], %66 {strides = array<i32>} : memref<1x128xf32, #tpu.memory_space<vmem>>, vector<1x128xf32>,
    return
  }
}

</mosaic_0001>

<bundles_post_ra>
// kernel: milnet_forward.1
= control target key start
LH: loop header
LB: loop body
LE: loop exit
PB: predicated region body
PF: predicated region fallthrough
CT: control target
= control target key end

     0   :  { %17 = vsyncpa [#allocation3], 0  ;;  %s879_s0 = inlined_call_operand.vmem [shape: bf16[8,32], index: 0, kind: input, shape index: {}]   ;;  %s880_s1 = inlined_call_operand.vmem [shape: bf16[4,32], index: 1, kind: input, shape index: {}]   ;;  %s881_s2 = inlined_call_operand.hbm [shape: bf16[32,256], index: 2, kind: input, shape index: {}]   ;;  %s882_s3 = inlined_call_operand.vmem [shape: f32[1,256], index: 3, kind: input, shape index: {}]   ;;  %s883_s4 = inlined_call_operand.hbm [shape: bf16[128,128], index: 4, kind: input, shape index: {}]   ;;  %s884_s5 = inlined_call_operand.vmem [shape: f32[1,128], index: 5, kind: input, shape index: {}]   ;;  %s885_s6 = inlined_call_operand.hbm [shape: bf16[128,128], index: 6, kind: input, shape index: {}]   ;;  %s886_s7 = inlined_call_operand.vmem [shape: f32[1,128], index: 7, kind: input, shape index: {}]   ;;  %s887_s8 = inlined_call_operand.vmem [shape: f32[8,128], index: 8, kind: output, shape index: {0}]   ;;  %s888_s9 = inlined_call_operand.hbm [shape: f32[1,128], index: 9, kind: output, shape index: {1}]   ;;  %s889_s10 = inlined_call_operand.hbm [shape: f32[4,8], index: 10, kind: output, shape index: {2}]   ;;  %s890_s11 = inlined_call_operand.vmem [shape: f32[1,128], index: 11, kind: output, shape index: {3}]  }
   0x1   :  { %18 = vsyncpa [#allocation6], 0 }
   0x2   :  { %19 = vsyncpa [#allocation4], 0  ;;  %s44_s19 = sshll.u32 %s883_s4, 4  ;;  %s45_s19 = int_to_ptr.hbm [resolvable:$true] %s44_s19 }
   0x3   :  { %20 = vsyncpa [#allocation10], 0  ;;  %s735_s20 = smov [#allocation5]   ;;  %s29_s24 = sshll.u32 %s881_s2, 4  ;;  %s30_s24 = int_to_ptr.hbm [resolvable:$true] %s29_s24 }
   0x4   :  { %s46_s21 = sshll.u32 %s735_s20, 4  ;;  %s736_s25 = smov 64   ;;  %s47_s21 = int_to_ptr.vmem [resolvable:$true] %s46_s21 }
   0x5   :  { %s737_s26 = smov 4   ;;  %s738_s27 = smov [#allocation2]  }
   0x6   :  { %52 = dma.hbm_to_vmem [thread:$0]  %s45_s19, 1024, %s47_s21, [#allocation6], %s736_s25, %s736_s25, %s737_s26  }
   0x7   :  { %s31_s28 = sshll.u32 %s738_s27, 4  ;;  %s739_s29 = smov 128   ;;  %s32_s28 = int_to_ptr.vmem [resolvable:$true] %s31_s28 }
   0x8   :  { %s740_s4 = smov 8   ;;  %s59_s13 = sshll.u32 %s885_s6, 4  ;;  %s60_s13 = int_to_ptr.hbm [resolvable:$true] %s59_s13 }
   0x9   :  { %37 = dma.hbm_to_vmem [thread:$0]  %s30_s24, 512, %s32_s28, [#allocation3], %s739_s29, %s739_s29, %s740_s4  }
   0xa   :  { %s741_s14 = smov [#allocation7]  }
   0xb   :  { %s61_s15 = sshll.u32 %s741_s14, 4  ;;  %s62_s15 = int_to_ptr.vmem [resolvable:$true] %s61_s15 }
   0xc   :  { %67 = dma.hbm_to_vmem [thread:$0]  %s60_s13, 1024, %s62_s15, [#allocation6], %s736_s25, %s736_s25, %s737_s26  }
   0xd   :  { %727 = dma.done.wait [#allocation3], 512  }
   0xe   :  { %728 = vsyncadd [#allocation3], 4294966784 }
   0xf   :  { %729 = dma.done.wait [#allocation6], 2048  }
  0x10   :  { %730 = vsyncadd [#allocation6], 4294965248  ;;  %vm114_vm0 = vcmask 261120   ;;  %v823_v0 = vld [vmem:[%s879_s0] sm:$0xf]  ;;  %vm247_vm1 = vcmask 60416   ;;  %v251_v25 = vlaneseq }
  0x11   :  { %v116_v1 = vsel %vm114_vm0, %v823_v0, 0  ;;  %v230_v2 = vld [vmem:[%s880_s1] sm:$0x3]  ;;  %v492_v3 = vld [vmem:[#allocation2 + $0x10] sm:$0xf]  ;;  %v579_v18 = vld [vmem:[#allocation5 + $0x38] sm:$0xff] }
  0x12   :  { %241 = vmatpush.bf16.xpose.msra.mxu3 %v116_v1  ;;  %v571_v4 = vld [vmem:[#allocation2 + $0x14] sm:$0xf0]  ;;  %v484_v5 = vld [vmem:[#allocation2] sm:$0xf]  ;;  %v569_v7 = vld [vmem:[#allocation2 + $0x4] sm:$0xf0]  ;;  %215 = vmatpush.bf16.msra.mxu2 %v579_v18 }
  0x13   :  { %v493_v6 = vor.u32 %v571_v4, %v492_v3  ;;  %v570_v8 = vld [vmem:[#allocation2 + $0x14] sm:$0xf]  ;;  %v494_v9 = vld [vmem:[#allocation2 + $0x18] sm:$0xf0]  ;;  %v485_v10 = vor.u32 %v569_v7, %v484_v5  ;;  %v568_v12 = vld [vmem:[#allocation2 + $0x4] sm:$0xf] }
  0x14   :  { %v497_v11 = vor.u32 %v570_v8, %v494_v9  ;;  %v486_v13 = vld [vmem:[#allocation2 + $0x8] sm:$0xf0]  ;;  %v578_v19 = vld [vmem:[#allocation5 + $0x30] sm:$0xff]  ;;  %v576_v21 = vld [vmem:[#allocation5 + $0x20] sm:$0xff]  ;;  %v252_v29 = vand.u32 127, %v251_v25  ;;  %vm278_vm4 = vcmask 1043456  }
  0x15   :  { %124 = vmatpush.bf16.msra.mxu1 %v493_v6  ;;  %v489_v14 = vor.u32 %v568_v12, %v486_v13  ;;  %v577_v20 = vld [vmem:[#allocation5 + $0x28] sm:$0xff]  ;;  %v88_v22 = vld [vmem:[%s882_s3] sm:$0x3]  ;;  %v575_v23 = vld [vmem:[#allocation5 + $0x18] sm:$0xff]  ;;  %v742_v60 = vmov 0.0   ;;  %vm274_vm6 = vcmask 64512  }
  0x16   :  { %216 = vmatpush.bf16.msra.mxu2 %v578_v19  ;;  %v90_v24 = vperm.slane %v88_v22, 0  ;;  %v574_v27 = vld [vmem:[#allocation5 + $0x10] sm:$0xff]  ;;  %v573_v30 = vld [vmem:[#allocation5 + $0x8] sm:$0xff]  ;;  %v572_v34 = vld [vmem:[#allocation5] sm:$0xff]  ;;  %v91_v38 = vperm.slane %v88_v22, 1  ;;  %v326_v7 = vsel %vm278_vm4, %v823_v0, 0 }
  0x17   :  { %v600_v48 = vld [vmem:[%s884_s5] ss:$0 sm:$0xff]  ;;  %vm341_vm7 = vcmask 253952   ;;  %s743_s21 = smov 96   ;;  %s744_s22 = smov 32   ;;  %v587_v18 = vld [vmem:[#allocation7 + $0x38] sm:$0xff] }
  0x18   :  { %v586_v19 = vld [vmem:[#allocation7 + $0x30] sm:$0xff]  ;;  %v583_v22 = vld [vmem:[#allocation7 + $0x18] sm:$0xff]  ;;  %v580_v25 = vld [vmem:[#allocation7] sm:$0xff]  ;;  %vm347_vm8 = vcmask 517377   ;;  %vm352_vm9 = vcmask 780802   ;;  %vm357_vm10 = vcmask 1044227  }
  0x19   :  { %532 = vmatmul.msk.bf16.vlgmr.msra.gmra.mxu3 %vm114_vm0, %v230_v2  ;;  %125 = vmatpush.bf16.msra.mxu1 %v485_v10  ;;  %s745_s30 = smov [#allocation9]   ;;  %s460_s15 = sshll.u32 %s889_s10, 4  ;;  %s461_s15 = int_to_ptr.hbm [resolvable:$true] %s460_s15 }
  0x1a   :  { %217 = vmatpush.bf16.msra.mxu2 %v577_v20  ;;  %335 = vmatpush.bf16.msrb.mxu3 %v326_v7  ;;  %v585_v20 = vld [vmem:[#allocation7 + $0x28] sm:$0xff]  ;;  %s458_s12 = sshll.u32 %s745_s30, 4  ;;  %s746_s6 = smov [#allocation8]   ;;  %s459_s12 = int_to_ptr.vmem [resolvable:$true] %s458_s12 }
  0x1b   :  { %s447_s17 = sshll.u32 %s746_s6, 4  ;;  %s448_s17 = int_to_ptr.vmem [resolvable:$true] %s447_s17 }
  0x1c   :  { %498 = vmatmul.msk.bf16.vlgmr.msra.gmra.mxu1 %vm114_vm0, %v823_v0 }
  0x1d   :  { %137 = vmatpush.bf16.msrb.mxu1 %v497_v11 }
  0x1e   :  { %218 = vmatpush.bf16.msra.mxu2 %v576_v21  ;;  %v584_v21 = vld [vmem:[#allocation7 + $0x20] sm:$0xff] }
  0x21   :  { %138 = vmatpush.bf16.msrb.mxu1 %v489_v14 }
  0x22   :  { %219 = vmatpush.bf16.msra.mxu2 %v575_v23  ;;  %v582_v23 = vld [vmem:[#allocation7 + $0x10] sm:$0xff] }
  0x26   :  { %220 = vmatpush.bf16.msra.mxu2 %v574_v27 }
  0x2a   :  { %221 = vmatpush.bf16.msra.mxu2 %v573_v30 }
  0x2c   :  { %499 = vmatmul.msk.bf16.vlgmr.msrb.gmra.mxu1 %vm114_vm0, %v823_v0 }
  0x2e   :  { %222 = vmatpush.bf16.msra.mxu2 %v572_v34 }
  0x99   :  { %v127_v26 = vpop.f32.mrf.mxu1 }
  0x9a   :  { %v128_v28 = vadd.f32 %v127_v26, %v90_v24  ;;  %v581_v24 = vld [vmem:[#allocation7 + $0x8] sm:$0xff] }
  0x9c   :  { %v243_v15 = vpop.f32.mrf.mxu3  ;;  %144 = vst [vmem:[%s887_s8] sm:$0xff] %v128_v28 }
  0x9d   :  { %v248_v16 = vsel %vm247_vm1, %v243_v15, -inf }
  0x9e   :  { %249 = vmax.xlane.f32.xlu0 %v248_v16 }
  0xa1   :  { %v129_v33 = vpop.f32.mrf.mxu1 }
  0xa4   :  { %v245_v17 = vpop.f32.mrf.mxu3 }
  0xa9   :  { %v140_v39 = vpop.f32.mrf.mxu1 }
  0xaa   :  { %v141_v40 = vadd.f32 %v140_v39, %v91_v38 }
  0xac   :  { %v145_v41 = vmax.f32 %v141_v40, 0.0 }
  0xae   :  { %v146_v42 = vpack.c.bf16 %v145_v41, %v145_v41 }
  0xb0   :  { %223 = vmatmul.bf16.vlgmr.msra.gmra.mxu2 %v146_v42 }
  0xb1   :  { %v142_v43 = vpop.f32.mrf.mxu1 }
 0x111   :  { %v250_v31 = vpop.xlane.xlu0 %249 }
 0x112   :  { %vm253_vm2 = vcmp.eq.f32.partialorder %v243_v15, %v250_v31  ;;  %v377_v31 = vld [vmem:[%s886_s7] sm:$0x1] }
 0x113   :  { %v254_v32 = vsel %vm253_vm2, %v252_v29, 8 }
 0x114   :  { %v255_v35 = vsel %vm247_vm1, %v254_v32, 2147483647 }
 0x115   :  { %v257_v36 = vshra.s32 %v255_v35, 16  ;;  %v256_v44 = vand.u32 65535, %v255_v35 }
 0x117   :  { %v259_v37 = vcvt.s32.f32 %v257_v36  ;;  %v258_v46 = vcvt.s32.f32 %v256_v44 }
 0x119   :  { %260 = vmin.xlane.f32.xlu0 %v259_v37 }
 0x133   :  { %v224_v49 = vpop.f32.mrf.mxu2 }
 0x134   :  { %v225_v50 = vadd.f32 %v600_v48, %v224_v49 }
 0x136   :  { %601 = vtanh.f32 %v225_v50 }
 0x13b   :  { %v226_v51 = vpop.f32.mrf.mxu2 }
 0x13c   :  { %v602_v52 = vpop.eup %601 }
 0x13d   :  { %v229_v53 = vpack.c.bf16 %v602_v52, %v602_v52 }
 0x13f   :  { %304 = vmatpush.bf16.xpose.msra.mxu1 %v229_v53  ;;  %v280_v54 = vsel %vm278_vm4, %v229_v53, 0 }
 0x140   :  { %289 = vmatpush.bf16.msra.mxu0 %v280_v54 }
 0x144   :  { %426 = vmatpush.bf16.msrb.mxu0 %v587_v18 }
 0x148   :  { %427 = vmatpush.bf16.msrb.mxu0 %v586_v19 }
 0x14c   :  { %428 = vmatpush.bf16.msrb.mxu0 %v585_v20 }
 0x150   :  { %429 = vmatpush.bf16.msrb.mxu0 %v584_v21 }
 0x154   :  { %430 = vmatpush.bf16.msrb.mxu0 %v583_v22 }
 0x158   :  { %431 = vmatpush.bf16.msrb.mxu0 %v582_v23 }
 0x15c   :  { %432 = vmatpush.bf16.msrb.mxu0 %v581_v24 }
 0x160   :  { %433 = vmatpush.bf16.msrb.mxu0 %v580_v25 }
 0x18c   :  { %v261_v45 = vpop.xlane.xlu0 %260 }
 0x18d   :  { %vm262_vm3 = vcmp.eq.f32.partialorder %v259_v37, %v261_v45  ;;  %v267_v55 = vcvt.f32.s32 %v261_v45 }
 0x18e   :  { %v263_v47 = vsel %vm262_vm3, %v258_v46, inf }
 0x18f   :  { %264 = vmin.xlane.f32.xlu1 %v263_v47  ;;  %v268_v57 = vshll.u32 %v267_v55, 16 }
 0x202   :  { %v265_v56 = vpop.xlane.xlu1 %264 }
 0x203   :  { %v266_v58 = vcvt.f32.s32 %v265_v56 }
 0x205   :  { %v269_v59 = vadd.s32 %v268_v57, %v266_v58 }
 0x207   :  { %vm270_vm5 = vcmp.eq.s32.totalorder %v252_v29, %v269_v59 }
 0x208   :  { %v533_v61 = vsel %vm270_vm5, 1.0, %v742_v60 }
 0x209   :  { %v273_v62 = vpack.c.bf16 %v533_v61, %v533_v61 }
 0x20b   :  { %534 = vmatmul.msk.bf16.vlgmr.msra.gmra.mxu0 %vm274_vm6, %v273_v62 }
 0x288   :  { %v291_v63 = vpop.f32.mrf.mxu0 }
 0x289   :  { %v295_v1 = vmul.f32 0.088388346, %v291_v63 }
 0x28b   :  { %v296_v2 = vpack.c.bf16 %v295_v1, %v295_v1 }
 0x28d   :  { %305 = vmatmul.bf16.vlgmr.msra.gmra.mxu1 %v296_v2 }
 0x290   :  { %v293_v3 = vpop.f32.mrf.mxu0 }
 0x30a   :  { %v306_v4 = vpop.f32.mrf.mxu1 }
 0x30b   :  { %v310_v5 = vsel %vm247_vm1, %v306_v4, -inf }
 0x30c   :  { %311 = vmax.xlane.f32.xlu1 %v310_v5 }
 0x312   :  { %v308_v6 = vpop.f32.mrf.mxu1 }
 0x37f   :  { %v312_v8 = vpop.xlane.xlu1 %311 }
 0x380   :  { %v313_v9 = vsub.f32 %v306_v4, %v312_v8 }
 0x382   :  { %v314_v10 = vmul.f32 1.442695, %v313_v9 }
 0x384   :  { %603 = vpow2.f32 %v314_v10 }
 0x38a   :  { %v604_v11 = vpop.eup %603 }
 0x38b   :  { %v316_v12 = vsel %vm247_vm1, %v604_v11, 0.0 }
 0x38c   :  { %317 = vadd.xlane.f32.xlu2 %v316_v12 }
 0x3ff   :  { %v318_v13 = vpop.xlane.xlu2 %317 }
 0x400   :  { %605 = vrcp.f32 %v318_v13 }
 0x406   :  { %v606_v14 = vpop.eup %605 }
 0x407   :  { %v320_v15 = vmul.f32 %v606_v14, %v604_v11 }
 0x409   :  { %321 = vst.msk [vmem:[#allocation9] sm:$0xf] %vm247_vm1, %v320_v15  ;;  %v322_v16 = vpack.c.bf16 %v320_v15, %v320_v15 }
 0x40a   :  { %463 = dma.vmem_to_hbm [thread:$0]  %s459_s12, 64, %s461_s15, [#allocation10]  }
 0x40b   :  { %535 = vmatmul.msk.bf16.vlgmr.msrb.gmra.mxu3 %vm274_vm6, %v322_v16 }
 0x48e   :  { %v337_v0 = vpop.f32.mrf.mxu3 }
 0x48f   :  { %342 = vst.msk [vmem:[%s890_s11] sm:$0x1] %vm341_vm7, %v337_v0  ;;  %354 = vrot.lane.b32.xlu1 %v337_v0, %s743_s21  ;;  %349 = vrot.lane.b32.xlu0 %v337_v0, %s736_s25 }
 0x490   :  { %344 = vrot.lane.b32.xlu2 %v337_v0, %s744_s22 }
 0x496   :  { %v339_v17 = vpop.f32.mrf.mxu3 }
 0x4ea   :  { %v345_v26 = vpop.permute.xlu2 %344 }
 0x4eb   :  { %348 = vst.msk [vmem:[%s890_s11 - $0x1] sm:$0x2] %vm347_vm8, %v345_v26 }
 0x501   :  { %v355_v27 = vpop.permute.xlu1 %354  ;;  %v350_v28 = vpop.permute.xlu0 %349 }
 0x502   :  { %353 = vst.msk [vmem:[%s890_s11 - $0x2] sm:$0x4] %vm352_vm9, %v350_v28 }
 0x503   :  { %358 = vst.msk [vmem:[%s890_s11 - $0x3] sm:$0x8] %vm357_vm10, %v355_v27 }
 0x50a   :  { %v359_v29 = vld [vmem:[%s890_s11] sm:$0x1]  ;;  %s449_s11 = sshll.u32 %s888_s9, 4  ;;  %s450_s11 = int_to_ptr.hbm [resolvable:$true] %s449_s11 }
 0x50b   :  { %v360_v30 = vpack.c.bf16 %v359_v29, %v359_v29 }
 0x50d   :  { %434 = vmatmul.bf16.vlgmr.msrb.gmra.mxu0 %v360_v30 }
 0x58a   :  { %v435_v32 = vpop.f32.mrf.mxu0 }
 0x58b   :  { %v436_v33 = vadd.f32 %v435_v32, %v377_v31 }
 0x58d   :  { %439 = vst [vmem:[#allocation8] sm:$0x1] %v436_v33 }
 0x58e   :  { %452 = dma.vmem_to_hbm [thread:$0]  %s448_s17, 16, %s450_s11, [#allocation4]  }
 0x592   :  { %v437_v34 = vpop.f32.mrf.mxu0 }
 0x593   :  { %731 = dma.done.wait [#allocation4], 16  }
 0x594   :  { %732 = vsyncadd [#allocation4], 4294967280 }
 0x595   :  { %733 = dma.done.wait [#allocation10], 64  }
 0x596   :  { %734 = vsyncadd [#allocation10], 4294967232 }
 0x597   :  { %478 = vsyncpa [#allocation3], 1 }
 0x598   :  { %479 = vsyncpa [#allocation6], 1 }
 0x599   :  { %480 = vsyncpa [#allocation4], 1 }
 0x59a   :  { %481 = vsyncpa [#allocation10], 1 }

</bundles_post_ra>
